<compile_context>
chip_gen: v5e
topology: v5e:2x2
jax: 0.10.0
libtpu: 0.0.40
codegen_flags: <defaults>
</compile_context>

<pallas_src>
import jax
import jax.numpy as jnp
from jax import lax
from jax.experimental import pallas as pl
from jax.experimental.pallas import tpu as pltpu


# ----------------------------------------------------------------------------
# Kernel
# ----------------------------------------------------------------------------
def _corr_kernel(a_ref, b_ref, p_ref, o_ref):
    # a_ref: (Bt, C, HW)  A in native flattening, q = hj*w + wj
    # b_ref: (Bt, C, HW)  B in native flattening, i = hi*w + wi
    # p_ref: (HW, TJ)     one-hot column permutation, P[q, j] = 1 iff q = (j%h)*w + j//h
    # o_ref: (Bt, TJ, HW) o[b, j, i] = sum_c A[b, c, hj, wj] * B[b, c, hi, wi]
    bt = a_ref.shape[0]
    cdt = p_ref.dtype
    p = p_ref[...]  # loaded once per grid step, reused across the batch loop

    def compute_one(t):
        a = a_ref[t].astype(cdt)            # (C, HW)
        bm = b_ref[t].astype(cdt)           # (C, HW)
        # Fold the PyTorch transpose(2,3) of A into the kernel: A_t = A_nat @ P.
        # One nonzero per P column -> exact selection (even in bf16).
        a_t = lax.dot_general(
            a, p,
            dimension_numbers=(((1,), (0,)), ((), ())),
            preferred_element_type=jnp.float32,
        ).astype(cdt)                       # (C, TJ)
        # Main contraction over c, f32 accumulation on the MXU.
        acc = lax.dot_general(
            a_t, bm,
            dimension_numbers=(((0,), (0,)), ((), ())),
            preferred_element_type=jnp.float32,
        )                                   # (TJ, HW) -- lane-dense store
        o_ref[t] = acc.astype(o_ref.dtype)

    if bt <= 4:
        for t in range(bt):                 # short static loop, unrolled at trace time
            compute_one(t)
    else:
        # Rolled loop bounds vreg live ranges when many batches fold per step.
        def body(t, carry):
            compute_one(t)
            return carry
        lax.fori_loop(0, bt, body, 0)


# ----------------------------------------------------------------------------
# Tiling heuristics (generation aware)
# ----------------------------------------------------------------------------
def _round_up(x, m):
    return (x + m - 1) // m * m


def _block_bytes(shape, elt_bytes):
    """VMEM bytes of a block, honoring (sublane, 128-lane) tile padding."""
    if not shape:
        return elt_bytes
    sub = 8 * max(1, 4 // elt_bytes)        # 8 sublanes f32, 16 bf16, 32 int8
    lane = _round_up(shape[-1], 128)
    if len(shape) == 1:
        return lane * elt_bytes
    subl = _round_up(shape[-2], sub)
    lead = 1
    for d in shape[:-2]:
        lead *= d
    return lead * subl * lane * elt_bytes


def _tpu_generation():
    try:
        kind = jax.devices()[0].device_kind.lower()
    except Exception:
        return "unknown"
    if "v5 lite" in kind or "v5lite" in kind or "v5e" in kind:
        return "v5e"
    if "v6" in kind:
        return "v6e"
    if "v7" in kind or "7x" in kind:
        return "v7x"
    return "unknown"


def _vmem_capacity_bytes():
    try:
        return int(pltpu.get_tpu_info().vmem_capacity_bytes)
    except Exception:
        return 64 * 1024 * 1024             # conservative: v7x per-TensorCore VMEM


def _pick_tiles(b, c, hw, in_elt, cmp_elt, out_elt, *, vmem_cap, gen):
    """Choose (batch tile Bt, output-row tile TJ, vmem_limit_bytes)."""
    budget = int(vmem_cap * 0.70)           # ~90 MiB on v5e/v6e, ~45 MiB on v7x

    def footprint(bt, tj):
        # Double-buffered pipeline copies of every block (padded) ...
        pipe = 2 * (2 * _block_bytes((bt, c, hw), in_elt)      # A + B blocks
                    + _block_bytes((hw, tj), cmp_elt)          # permutation block
                    + _block_bytes((bt, tj, hw), out_elt))     # output block
        # ... plus in-kernel f32 temporaries and Mosaic internal-scratch slack.
        tmp = _block_bytes((c, tj), 4) + _block_bytes((tj, hw), 4) + (1 << 20)
        return pipe + tmp

    # TJ: keep the full hw row block when it fits; otherwise the largest
    # multiple of 128 that fits (ragged last block is handled by Pallas, so
    # output stores stay full-lane vst inside the kernel).
    tj = hw
    if hw > 128 and footprint(1, hw) > budget:
        tj = (hw // 128) * 128
        while tj > 128 and footprint(1, tj) > budget:
            tj -= 128
    n_j = pl.cdiv(hw, tj)

    # Fold batches to amortize the ~0.35 us/step pipeline overhead; the
    # per-step output-size target scales with each generation's HBM bandwidth.
    target = {"v5e": 512 << 10, "v6e": 1536 << 10, "v7x": 3 << 20}.get(gen, 1 << 20)
    bt = 1
    while (bt < b and b % (bt * 2) == 0
           and (b // (bt * 2)) * n_j >= 2           # keep >= 2 grid steps
           and bt * tj * hw * out_elt < target
           and footprint(bt * 2, tj) <= budget):
        bt *= 2

    # v7x megacore: keep the parallel step count even so neither TC idles.
    if gen == "v7x":
        steps = (b // bt) * n_j
        if steps % 2 == 1 and bt > 1:
            bt //= 2

    fp = footprint(bt, tj)
    vmem_limit = max(min(fp + (4 << 20), int(vmem_cap * 0.9)), 32 << 20)
    return bt, tj, vmem_limit


# ----------------------------------------------------------------------------
# Public wrapper
# ----------------------------------------------------------------------------
def feature_correlation(feature_A, feature_B, *, out_dtype=None, compute_dtype=None):
    """Pallas implementation of FeatureCorrelation.forward.

    feature_A, feature_B: (b, c, h, w).  Returns (b, h*w, h, w).
    `compute_dtype`/`out_dtype` may be set to jnp.bfloat16 to halve input DMA /
    output writeback (documented precision deviation from the f32 PyTorch
    reference); defaults keep everything in the input dtype.
    """
    b, c, h, w = feature_A.shape
    hw = h * w
    in_dtype = jnp.dtype(feature_A.dtype)
    cdt = jnp.dtype(compute_dtype) if compute_dtype is not None else in_dtype
    odt = jnp.dtype(out_dtype) if out_dtype is not None else in_dtype

    # Free contiguous reshapes only -- no host-side HBM transpose pass.
    a_nat = feature_A.reshape(b, c, hw)     # q = hj*w + wj
    b_nat = feature_B.reshape(b, c, hw)     # i = hi*w + wi

    # One-hot commutation matrix: column j of (A_nat @ P) is A[:, j % h, j // h],
    # i.e. the j = wj*h + hj ordering used by the PyTorch module.  Depends only
    # on static shapes, so it constant-folds under jit.
    j_idx = jnp.arange(hw, dtype=jnp.int32)
    q_of_j = (j_idx % h) * w + (j_idx // h)
    perm = (jnp.arange(hw, dtype=jnp.int32)[:, None] == q_of_j[None, :]).astype(cdt)

    gen = _tpu_generation()
    vmem_cap = _vmem_capacity_bytes()
    bt, tj, vmem_limit = _pick_tiles(
        b, c, hw, in_dtype.itemsize, cdt.itemsize, odt.itemsize,
        vmem_cap=vmem_cap, gen=gen)

    grid = (b // bt, pl.cdiv(hw, tj))

    cost = pl.CostEstimate(
        flops=4 * b * c * hw * hw,          # permutation matmul + main matmul
        transcendentals=0,
        bytes_accessed=(2 * b * c * hw * in_dtype.itemsize
                        + hw * hw * cdt.itemsize
                        + b * hw * hw * odt.itemsize),
    )

    out = pl.pallas_call(
        _corr_kernel,
        out_shape=jax.ShapeDtypeStruct((b, hw, hw), odt),
        grid_spec=pl.GridSpec(
            grid=grid,
            in_specs=[
                # A/B block indices are constant along the inner (ij) axis, so
                # the pipeline re-uses them without re-DMA.
                pl.BlockSpec((bt, c, hw), lambda ib, ij: (ib, 0, 0)),
                pl.BlockSpec((bt, c, hw), lambda ib, ij: (ib, 0, 0)),
                pl.BlockSpec((hw, tj), lambda ib, ij: (0, ij)),
            ],
            out_specs=pl.BlockSpec((bt, tj, hw), lambda ib, ij: (ib, ij, 0)),
        ),
        compiler_params=pltpu.CompilerParams(
            dimension_semantics=("parallel", "parallel"),
            vmem_limit_bytes=vmem_limit,
        ),
        cost_estimate=cost,
    )(a_nat, b_nat, perm)

    # out[b, j, i] with j = wj*h + hj, i = hi*w + wi; the torch layout is a free
    # reshape of this to (b, h*w, h, w).
    return out.reshape(b, hw, h, w)


# ----------------------------------------------------------------------------
# Pure-JAX reference (transcription of the PyTorch forward) + self-test
# ----------------------------------------------------------------------------
def _reference(feature_A, feature_B):
    b, c, h, w = feature_A.shape
    fa = jnp.transpose(feature_A, (0, 1, 3, 2)).reshape(b, c, h * w)
    fb = jnp.transpose(feature_B.reshape(b, c, h * w), (0, 2, 1))
    fm = jnp.einsum("bic,bcj->bij", fb, fa)          # (b, hw_i, hw_j)
    corr = fm.reshape(b, h, w, h * w)
    corr = jnp.transpose(corr, (0, 1, 3, 2))         # transpose(2,3)
    corr = jnp.transpose(corr, (0, 2, 1, 3))         # transpose(1,2)
    return corr


if __name__ == "__main__":
    key = jax.random.PRNGKey(0)
    k_a, k_b = jax.random.split(key)
    b, c, h, w = 2, 4, 16, 16
    feature_A = jax.random.normal(k_a, (b, c, h, w), dtype=jnp.float32)
    feature_B = jax.random.normal(k_b, (b, c, h, w), dtype=jnp.float32)

    out = jax.block_until_ready(feature_correlation(feature_A, feature_B))
    ref = jax.block_until_ready(_reference(feature_A, feature_B))

    assert out.shape == (b, h * w, h, w), out.shape
    assert jnp.allclose(out, ref, atol=1e-4, rtol=1e-4), "mismatch vs reference"

    print("KERNEL_OK")
</pallas_src>

<mosaic_0001>
module attributes {stable_mosaic.version = 11 : i64} {
  func.func @_corr_kernel(%arg0: i32, %arg1: i32, %arg2: memref<1x4x256xf32, #tpu.memory_space<vmem>>, %arg3: memref<1x4x256xf32, #tpu.memory_space<vmem>>, %arg4: memref<256x256xf32, #tpu.memory_space<vmem>>, %arg5: memref<1x256x256xf32, #tpu.memory_space<vmem>>) attributes {dimension_semantics = [#tpu.dimension_semantics<parallel>, #tpu.dimension_semantics<parallel>], iteration_bounds = array<i64: 2, 1>, scalar_prefetch = 0 : i64, scratch_operands = 0 : i64, tpu.core_type = #tpu.core_type<tc>, window_params = [{transform_indices = @transform_0, window_bounds = array<i64: 1, 4, 256>}, {transform_indices = @transform_1, window_bounds = array<i64: 1, 4, 256>}, {transform_indices = @transform_2, window_bounds = array<i64: 256, 256>}, {transform_indices = @transform_3, window_bounds = array<i64: 1, 256, 256>}]} {
    %c0 = arith.constant 0 : index
    %c0_0 = arith.constant 0 : index
    %0 = vector.load %arg4[%c0, %c0_0] : memref<256x256xf32, #tpu.memory_space<vmem>>, vector<256x256xf32>
    %c0_1 = arith.constant 0 : index
    %c0_2 = arith.constant 0 : index
    %c0_3 = arith.constant 0 : index
    %1 = vector.load %arg2[%c0_1, %c0_2, %c0_3] : memref<1x4x256xf32, #tpu.memory_space<vmem>>, vector<1x4x256xf32>
    %2 = vector.shape_cast %1 : vector<1x4x256xf32> to vector<4x256xf32>
    %c0_4 = arith.constant 0 : index
    %c0_5 = arith.constant 0 : index
    %c0_6 = arith.constant 0 : index
    %3 = vector.load %arg3[%c0_4, %c0_5, %c0_6] : memref<1x4x256xf32, #tpu.memory_space<vmem>>, vector<1x4x256xf32>
    %4 = vector.shape_cast %3 : vector<1x4x256xf32> to vector<4x256xf32>
    %cst = arith.constant dense<0.000000e+00> : vector<4x256xf32>
    %5 = tpu.matmul %2, %0, %cst {dimension_numbers = #tpu.dot_dimension_numbers<[1], [0], [0], [1], [0, 0, 1, 1], [], []>} : vector<4x256xf32>, vector<256x256xf32>, vector<4x256xf32> -> vector<4x256xf32>
    %cst_7 = arith.constant dense<0.000000e+00> : vector<256x256xf32>
    %6 = tpu.matmul %5, %4, %cst_7 {dimension_numbers = #tpu.dot_dimension_numbers<[0], [0], [1], [1], [0, 1, 1, 1], [], []>} : vector<4x256xf32>, vector<4x256xf32>, vector<256x256xf32> -> vector<256x256xf32>
    %c0_8 = arith.constant 0 : index
    %c0_9 = arith.constant 0 : index
    %c0_10 = arith.constant 0 : index
    %7 = vector.load %arg5[%c0_8, %c0_9, %c0_10] : memref<1x256x256xf32, #tpu.memory_space<vmem>>, vector<1x256x256xf32>
    %8 = vector.shape_cast %7 : vector<1x256x256xf32> to vector<256x256xf32>
    %9 = vector.shape_cast %6 : vector<256x256xf32> to vector<1x256x256xf32>
    tpu.vector_store %arg5[%c0_8, %c0_9, %c0_10], %9 {strides = array<i32>} : memref<1x256x256xf32, #tpu.memory_space<vmem>>, vector<1x256x256xf32>,
    return
  }
  func.func @transform_0(%arg0: i32, %arg1: i32) -> (i32, i32, i32) {
    %c0_i32 = arith.constant 0 : i32
    %c0_i32_0 = arith.constant 0 : i32
    %c0_i32_1 = arith.constant 0 : i32
    return %arg0, %c0_i32, %c0_i32_0 : i32, i32, i32
  }
  func.func @transform_1(%arg0: i32, %arg1: i32) -> (i32, i32, i32) {
    %c0_i32 = arith.constant 0 : i32
    %c0_i32_0 = arith.constant 0 : i32
    %c0_i32_1 = arith.constant 0 : i32
    return %arg0, %c0_i32, %c0_i32_0 : i32, i32, i32
  }
  func.func @transform_2(%arg0: i32, %arg1: i32) -> (i32, i32) {
    %c0_i32 = arith.constant 0 : i32
    %c0_i32_0 = arith.constant 0 : i32
    return %c0_i32, %arg1 : i32, i32
  }
  func.func @transform_3(%arg0: i32, %arg1: i32) -> (i32, i32, i32) {
    %c0_i32 = arith.constant 0 : i32
    %c0_i32_0 = arith.constant 0 : i32
    return %arg0, %arg1, %c0_i32 : i32, i32, i32
  }
}

</mosaic_0001>

<bundles_post_ra>
// kernel: tpu_custom_call.1
= control target key start
LH: loop header
LB: loop body
LE: loop exit
PB: predicated region body
PF: predicated region fallthrough
CT: control target
= control target key end

     0   :  { %s1698_s0 = inlined_call_operand.hbm [shape: f32[2,4,256], index: 0, kind: input, shape index: {}]   ;;  %s1699_s1 = inlined_call_operand.hbm [shape: f32[2,4,256], index: 1, kind: input, shape index: {}]   ;;  %s1700_s2 = inlined_call_operand.hbm [shape: f32[256,256], index: 2, kind: input, shape index: {}]   ;;  %s1701_s3 = inlined_call_operand.hbm [shape: f32[2,256,256], index: 3, kind: output, shape index: {}]  }
   0x1   :  { %1704 = sst [smem:[#allocation16_spill]] %s1700_s2 }
   0x2   :  { %8 = vsyncpa [#allocation3], 0 }
   0x3   :  { %10 = vsyncpa [#allocation3 + $0x1], 0 }
   0x4   :  { %11 = vsyncpa [#allocation6], 0 }
   0x5   :  { %13 = vsyncpa [#allocation6 + $0x1], 0 }
   0x6   :  { %14 = vsyncpa [#allocation4], 0 }
   0x7   :  { %16 = vsyncpa [#allocation4 + $0x1], 0  ;;  %s1400_s12 = smov 0   ;;  %s1402_s13 = smov 0  }
   0x8   :  { %s1404_s14 = smov 0   ;;  %s1406_s15 = smov 0  }
   0x9   :  { %s1408_s16 = smov 0   ;;  %s1410_s17 = smov 0  }
   0xa LB: > { %1705 = sst [smem:[#allocation13_spill]] %s1369_s16  ;;  %s1431_s18 = sadd.s32 4294967295, %s1373_s17   ;;  %s1373_s17 = sphi %s1410_s17, %s22_s17   ;;  %s1369_s16 = sphi %s1408_s16, %s1720_s16   ;;  %s1365_s15 = sphi %s1406_s15, %s1715_s15   ;;  %s1361_s14 = sphi %s1404_s14, %s1719_s14   ;;  %s1357_s13 = sphi %s1402_s13, %s1718_s13   ;;  %s1353_s12 = sphi %s1400_s12, %s1717_s12  }
   0xb   : > { %p1020_p0 = scmp.ge.s32.totalorder %s1373_s17, 1  ;;  %p55_p1 = scmp.eq.s32.totalorder %s1431_s18, 0 }
   0xc   : > { %p145_p2 = scmp.lt.s32.totalorder %s1373_s17, 3  ;;  %s1706_s2 = sld [smem:[#allocation16_spill]] }
   0xd   : > { %s1375_s23 = smov [#allocation7]   ;;  %p1022_p6 = scmp.ge.s32.totalorder %s1373_s17, 2 }
   0xe   : > { %p1439_p3 = pnand %p1020_p0, %p145_p2  ;;  %s161_s24 = sshll.u32 %s1375_s23, 4  ;;  %s162_s24 = int_to_ptr.vmem [resolvable:$true] %s161_s24 }
   0xf   : > { %s1376_s25 = smov 256   ;;  %s1377_s26 = smov 16  }
  0x10   : > { %p1120_p4 = pneg %p1439_p3  ;;  %s1019_s27 = sadd.s32 4294967294, %s1373_s17  }
  0x11   : > { %s34_s28 = sadd.s32 1, %s1369_s16  ;;  %s41_s29 = sadd.s32 1, %s1361_s14 }
  0x12   : > { %s159_s21 = sshll.u32 %s1706_s2, 4  ;;  %p1121_p5 = pnand %p1120_p4, %p55_p1  ;;  %s160_s21 = int_to_ptr.hbm [resolvable:$true] %s159_s21 }
  0x13   : > { %p36_p7 = scmp.ge.s32.totalorder %s34_s28, 2  ;;  %p48_p8 = scmp.ne.s32.totalorder %s1361_s14, %s1357_s13 }
  0x14   : > { %1123 = dma.hbm_to_vmem [thread:$0]  (!%p1121_p5), %s160_s21, 8192, %s162_s24, [#allocation6], %s1376_s25, %s1376_s25, %s1377_s26  }
  0x15   : > { %p49_p9 = scmp.eq.s32.totalorder %s1373_s17, 0  ;;  %p54_p10 = scmp.ne.s32.totalorder %s1357_s13, %s1353_s12 }
  0x16   : > { %s1722_s28 = smov (%p36_p7, %s34_s28), 0  ;;  %p132_p13 = scmp.eq.s32.totalorder %s1431_s18, 1 }
  0x17   : > { %1708 = sst [smem:[#allocation14_spill]] %s1722_s28  ;;  %p1458_p11 = por %p49_p9, %p48_p8 }
  0x18   : > { %p1464_p12 = por %p55_p1, %p54_p10  ;;  %s38_s5 = ssub.s32 %s1369_s16, %s1722_s28 }
  0x19   : > { %p39_p0 = scmp.eq.s32.totalorder %s38_s5, 0  ;;  %p138_p2 = scmp.eq.s32.totalorder %s1019_s27, 1 }
  0x1a   : > { %p1471_p4 = por %p132_p13, %p48_p8  ;;  %p1136_p5 = scmp.lt.s32.totalorder %s1373_s17, 2 }
  0x1b   : > { %s1477_s7 = scalar_select %p39_p0, %s1361_s14, %s41_s29  }
  0x1c   : > { %p1479_p7 = por %p138_p2, %p54_p10  ;;  %s175_s9 = sand.u32 1, %s1361_s14  }
  0x1d   : > { %1712 = sst [smem:[#allocation15_spill]] %s1477_s7  ;;  %s1023_s10 = sshll.u32 %s175_s9, 3 }
  0x1e   : > { %s1105_s11 = sshll.u32 %s1369_s16, 3  ;;  %s179_s23 = scalar_lea.vmem [#allocation2], %s1023_s10 }
  0x1f   : > { %s184_s21 = scalar_lea.hbm %s1698_s0, %s1105_s11  ;;  %s188_s24 = sshll.u32 %s179_s23, 4  ;;  %s189_s24 = int_to_ptr.vmem [resolvable:$true] %s188_s24 }
  0x20   : > { %s186_s25 = sshll.u32 %s184_s21, 4  ;;  %p1125_p8 = pnand %p1136_p5, %p1458_p11  ;;  %s187_s25 = int_to_ptr.hbm [resolvable:$true] %s186_s25 }
  0x21   : > { %s204_s29 = scalar_lea.hbm %s1699_s1, %s1105_s11  ;;  %s195_s5 = sand.u32 1, %s1373_s17  }
  0x22   : > { %s176_s2 = scalar_lea.sflag [#allocation3], %s175_s9  ;;  %s206_s28 = sshll.u32 %s204_s29, 4  ;;  %s207_s28 = int_to_ptr.hbm [resolvable:$true] %s206_s28 }
  0x23   : > { %1127 = dma.hbm_to_vmem [thread:$0]  (!%p1125_p8), %s187_s25, 128, %s189_s24, %s176_s2  }
  0x24   : > { %s199_s16 = scalar_lea.vmem [#allocation5], %s1023_s10  ;;  %s196_s19 = scalar_lea.sflag [#allocation6], %s195_s5 }
  0x25   : > { %s208_s7 = sshll.u32 %s199_s16, 4  ;;  %217 = sbr.rel (%p1439_p3) target bundleno = 759 (0x2f7), region = 32  ;;  %s209_s7 = int_to_ptr.vmem [resolvable:$true] %s208_s7 }
  0x26   : > { %1130 = dma.hbm_to_vmem [thread:$0]  (!%p1125_p8), %s207_s28, 128, %s209_s7, %s196_s19  }
  0x27   : > { %s1497_s30 = sand.u32 (!%p1439_p3), 1, %s1357_s13  }
  0x28   : > { %s1030_s11 = sshll.u32 (!%p1439_p3), %s1497_s30, 3  ;;  %s220_s20 = scalar_lea.sflag (!%p1439_p3), [#allocation3], %s1497_s30 }
  0x29   : > { %s1501_s9 = scalar_lea.vmem (!%p1439_p3), [#allocation2], %s1030_s11 }
  0x2a   : > { %1336 = dma.done.wait (%p1464_p12), %s220_s20, 128  }
  0x2b   : > { %1338 = vsyncadd (%p1464_p12), %s220_s20, 4294967168  ;;  %s229_s2 = sand.u32 1, %s1431_s18   ;;  %s1508_s22 = scalar_lea.vmem [#allocation5], %s1030_s11 }
  0x2c   : > { %s230_s16 = scalar_lea.sflag [#allocation6], %s229_s2 }
  0x2d   : > { %1340 = dma.done.wait (%p1464_p12), %s230_s16, 128  }
  0x2e   : > { %1342 = vsyncadd (%p1464_p12), %s230_s16, 4294967168 }
  0x2f   : > { %1344 = dma.done.wait (%p55_p1), [#allocation6], 8192  }
  0x30   : > { %1346 = vsyncadd (%p55_p1), [#allocation6], 4294959104  ;;  %v300_v0 = vld [vmem:[#allocation7 + $0xf8] sm:$0xff]  ;;  %v298_v2 = vld [vmem:[#allocation7 + $0xe8] sm:$0xff]  ;;  %vm586_vm0 = vcmask 1043456   ;;  %vm489_vm1 = vcmask 31744  }
  0x31   : > { %v332_v1 = vld [vmem:[#allocation7 + $0x1f8] sm:$0xff]  ;;  %381 = vmatpush.msra.mxu2 %v300_v0  ;;  %v330_v3 = vld [vmem:[#allocation7 + $0x1e8] sm:$0xff]  ;;  %v299_v16 = vld [vmem:[#allocation7 + $0xf0] sm:$0xff]  ;;  %s1033_s18 = sshll.u32 %s1497_s30, 9  ;;  %s1107_s4 = sshll.u32 %s1365_s15, 9 }
  0x32   : > { %401 = vmatpush.msra.mxu3 %v332_v1  ;;  %v296_v4 = vld [vmem:[#allocation7 + $0xd8] sm:$0xff]  ;;  %v294_v6 = vld [vmem:[#allocation7 + $0xc8] sm:$0xff]  ;;  %v331_v17 = vld [vmem:[#allocation7 + $0x1f0] sm:$0xff]  ;;  %341 = vmatpush.msra.mxu0 %v299_v16  ;;  %s1563_s28 = scalar_lea.vmem [#allocation8], %s1033_s18  ;;  %s896_s21 = scalar_lea.hbm %s1701_s3, %s1107_s4 }
  0x33   : > { %v328_v5 = vld [vmem:[#allocation7 + $0x1d8] sm:$0xff]  ;;  %382 = vmatpush.msra.mxu2 %v298_v2  ;;  %v326_v7 = vld [vmem:[#allocation7 + $0x1c8] sm:$0xff]  ;;  %361 = vmatpush.msra.mxu1 %v331_v17  ;;  %v297_v19 = vld [vmem:[#allocation7 + $0xe0] sm:$0xff]  ;;  %s897_s23 = sshll.u32 %s1563_s28, 4  ;;  %s899_s24 = sshll.u32 %s896_s21, 4  ;;  %s898_s23 = int_to_ptr.vmem [resolvable:$true] %s897_s23  ;;  %s900_s24 = int_to_ptr.hbm [resolvable:$true] %s899_s24 }
  0x34   : > { %402 = vmatpush.msra.mxu3 %v330_v3  ;;  %v292_v8 = vld [vmem:[#allocation7 + $0xb8] sm:$0xff]  ;;  %v290_v10 = vld [vmem:[#allocation7 + $0xa8] sm:$0xff]  ;;  %v329_v20 = vld [vmem:[#allocation7 + $0x1e0] sm:$0xff]  ;;  %342 = vmatpush.msra.mxu0 %v297_v19  ;;  %s882_s25 = scalar_lea.sflag [#allocation4], %s1497_s30  ;;  %s1297_s26 = sshra.s32 %s900_s24, 4  ;;  %s1298_s26 = int_to_ptr.hbm [resolvable:$true] %s1297_s26 }
  0x35   : > { %383 = vmatpush.msra.mxu2 %v296_v4  ;;  %v324_v9 = vld [vmem:[#allocation7 + $0x1b8] sm:$0xff]  ;;  %v322_v11 = vld [vmem:[#allocation7 + $0x1a8] sm:$0xff]  ;;  %v295_v21 = vld [vmem:[#allocation7 + $0xd0] sm:$0xff]  ;;  %362 = vmatpush.msra.mxu1 %v329_v20  ;;  %s1299_s15 = scalar_lea.hbm %s1298_s26, 512  ;;  %s1303_s5 = scalar_lea.hbm %s1701_s3, 1024 }
  0x36   : > { %403 = vmatpush.msra.mxu3 %v328_v5  ;;  %v288_v12 = vld [vmem:[#allocation7 + $0x98] sm:$0xff]  ;;  %v333_v14 = vld [vmem:[%s1501_s9] sm:$0xff]  ;;  %v327_v22 = vld [vmem:[#allocation7 + $0x1d0] sm:$0xff]  ;;  %343 = vmatpush.msra.mxu0 %v295_v21  ;;  %p1300_p1 = scmp.ne.s32.totalorder %s1298_s26, %s1299_s15  ;;  %p1304_p10 = scmp.lt.s32.totalorder %s1298_s26, %s1701_s3 }
  0x37   : > { %384 = vmatpush.msra.mxu2 %v294_v6  ;;  %v320_v13 = vld [vmem:[#allocation7 + $0x198] sm:$0xff]  ;;  %v286_v15 = vld [vmem:[#allocation7 + $0x88] sm:$0xff]  ;;  %336 = vst [vmem:[#allocation1] ss:$2 sm:$0xff] %v333_v14  ;;  %v293_v26 = vld [vmem:[#allocation7 + $0xc0] sm:$0xff]  ;;  %363 = vmatpush.msra.mxu1 %v327_v22  ;;  %p1305_p11 = scmp.lt.s32.totalorder %s1303_s5, %s1299_s15 }
  0x38   : > { %404 = vmatpush.msra.mxu3 %v326_v7  ;;  %v318_v18 = vld [vmem:[#allocation7 + $0x188] sm:$0xff]  ;;  %v284_v23 = vld [vmem:[#allocation7 + $0x78] sm:$0xff]  ;;  %v325_v27 = vld [vmem:[#allocation7 + $0x1c0] sm:$0xff]  ;;  %344 = vmatpush.msra.mxu0 %v293_v26  ;;  %p1301_p3 = pnand %p1300_p1, %p1471_p4 }
  0x39   : > { %385 = vmatpush.msra.mxu2 %v292_v8  ;;  %v316_v24 = vld [vmem:[#allocation7 + $0x178] sm:$0xff]  ;;  %v282_v25 = vld [vmem:[#allocation7 + $0x68] sm:$0xff]  ;;  %v291_v32 = vld [vmem:[#allocation7 + $0xb0] sm:$0xff]  ;;  %364 = vmatpush.msra.mxu1 %v325_v27  ;;  %p1306_p12 = por %p1305_p11, %p1304_p10 }
  0x3a   : > { %405 = vmatpush.msra.mxu3 %v324_v9  ;;  %v314_v28 = vld [vmem:[#allocation7 + $0x168] sm:$0xff]  ;;  %v280_v29 = vld [vmem:[#allocation7 + $0x58] sm:$0xff]  ;;  %v323_v33 = vld [vmem:[#allocation7 + $0x1b0] sm:$0xff]  ;;  %345 = vmatpush.msra.mxu0 %v291_v32  ;;  %p1302_p9 = pneg %p1301_p3 }
  0x3b   : > { %386 = vmatpush.msra.mxu2 %v290_v10  ;;  %v334_v30 = vld [vmem:[%s1508_s22] sm:$0xff]  ;;  %v289_v36 = vld [vmem:[#allocation7 + $0xa0] sm:$0xff]  ;;  %v278_v38 = vld [vmem:[#allocation7 + $0x48] sm:$0xff]  ;;  %365 = vmatpush.msra.mxu1 %v323_v33 }
  0x3c   : > { %406 = vmatpush.msra.mxu3 %v322_v11  ;;  %v312_v31 = vld [vmem:[#allocation7 + $0x158] sm:$0xff]  ;;  %v321_v37 = vld [vmem:[#allocation7 + $0x1a0] sm:$0xff]  ;;  %v310_v39 = vld [vmem:[#allocation7 + $0x148] sm:$0xff]  ;;  %346 = vmatpush.msra.mxu0 %v289_v36  ;;  %p1307_p13 = pnand %p1306_p12, %p1302_p9 }
  0x3d   : > { %387 = vmatpush.msra.mxu2 %v288_v12  ;;  %v287_v40 = vld [vmem:[#allocation7 + $0x90] sm:$0xff]  ;;  %v276_v42 = vld [vmem:[#allocation7 + $0x38] sm:$0xff]  ;;  %366 = vmatpush.msra.mxu1 %v321_v37  ;;  %v285_v44 = vld [vmem:[#allocation7 + $0x80] sm:$0xff] }
  0x3e   : > { %407 = vmatpush.msra.mxu3 %v320_v13  ;;  %v1520_v34 = vld.sshfl [vmem:[#allocation1] sm:$0xff pattern:$0x75316420]  ;;  %v1522_v35 = vld.sshfl [vmem:[#allocation1 + $0x8] sm:$0xff pattern:$0x75316420]  ;;  %347 = vmatpush.msra.mxu0 %v287_v40 }
  0x3f   : > { %388 = vmatpush.msra.mxu2 %v286_v15  ;;  %486 = vst [vmem:[#allocation1] ss:$2 sm:$0xff] %v334_v30  ;;  %v319_v41 = vld [vmem:[#allocation7 + $0x190] sm:$0xff]  ;;  %v308_v43 = vld [vmem:[#allocation7 + $0x138] sm:$0xff]  ;;  %v317_v45 = vld [vmem:[#allocation7 + $0x180] sm:$0xff] }
  0x40   : > { %408 = vmatpush.msra.mxu3 %v318_v18  ;;  %v274_v46 = vld [vmem:[#allocation7 + $0x28] sm:$0xff]  ;;  %367 = vmatpush.msra.mxu1 %v319_v41  ;;  %v283_v48 = vld [vmem:[#allocation7 + $0x70] sm:$0xff]  ;;  %v272_v50 = vld [vmem:[#allocation7 + $0x18] sm:$0xff] }
  0x41   : > { %389 = vmatpush.msra.mxu2 %v284_v23  ;;  %v306_v47 = vld [vmem:[#allocation7 + $0x128] sm:$0xff]  ;;  %v315_v49 = vld [vmem:[#allocation7 + $0x170] sm:$0xff]  ;;  %v304_v51 = vld [vmem:[#allocation7 + $0x118] sm:$0xff]  ;;  %348 = vmatpush.msra.mxu0 %v285_v44 }
  0x42   : > { %409 = vmatpush.msra.mxu3 %v316_v24  ;;  %368 = vmatpush.msra.mxu1 %v317_v45  ;;  %v281_v52 = vld [vmem:[#allocation7 + $0x60] sm:$0xff]  ;;  %v270_v54 = vld [vmem:[#allocation7 + $0x8] sm:$0xff]  ;;  %v279_v56 = vld [vmem:[#allocation7 + $0x50] sm:$0xff] }
  0x43   : > { %390 = vmatpush.msra.mxu2 %v282_v25  ;;  %v313_v53 = vld [vmem:[#allocation7 + $0x160] sm:$0xff]  ;;  %v302_v55 = vld [vmem:[#allocation7 + $0x108] sm:$0xff]  ;;  %349 = vmatpush.msra.mxu0 %v283_v48  ;;  %v311_v57 = vld [vmem:[#allocation7 + $0x150] sm:$0xff] }
  0x44   : > { %410 = vmatpush.msra.mxu3 %v314_v28  ;;  %369 = vmatpush.msra.mxu1 %v315_v49  ;;  %v277_v58 = vld [vmem:[#allocation7 + $0x40] sm:$0xff]  ;;  %v275_v60 = vld [vmem:[#allocation7 + $0x30] sm:$0xff] }
  0x45   : > { %391 = vmatpush.msra.mxu2 %v280_v29  ;;  %350 = vmatpush.msra.mxu0 %v281_v52  ;;  %v309_v59 = vld [vmem:[#allocation7 + $0x140] sm:$0xff]  ;;  %v307_v61 = vld [vmem:[#allocation7 + $0x130] sm:$0xff] }
  0x46   : > { %411 = vmatpush.msra.mxu3 %v312_v31  ;;  %370 = vmatpush.msra.mxu1 %v313_v53  ;;  %v273_v62 = vld [vmem:[#allocation7 + $0x20] sm:$0xff]  ;;  %v271_v0 = vld [vmem:[#allocation7 + $0x10] sm:$0xff]  ;;  %v487_v7 = vld.sshfl [vmem:[#allocation1] sm:$0xff pattern:$0x75316420] }
  0x47   : > { %392 = vmatpush.msra.mxu2 %v278_v38  ;;  %351 = vmatpush.msra.mxu0 %v279_v56  ;;  %v305_v63 = vld [vmem:[#allocation7 + $0x120] sm:$0xff]  ;;  %v303_v1 = vld [vmem:[#allocation7 + $0x110] sm:$0xff] }
  0x48   : > { %412 = vmatpush.msra.mxu3 %v310_v39  ;;  %371 = vmatpush.msra.mxu1 %v311_v57  ;;  %v269_v2 = vld [vmem:[#allocation7] sm:$0xff] }
  0x49   : > { %393 = vmatpush.msra.mxu2 %v276_v42  ;;  %352 = vmatpush.msra.mxu0 %v277_v58  ;;  %v301_v3 = vld [vmem:[#allocation7 + $0x100] sm:$0xff] }
  0x4a   : > { %413 = vmatpush.msra.mxu3 %v308_v43  ;;  %372 = vmatpush.msra.mxu1 %v309_v59  ;;  %v488_v8 = vld.sshfl [vmem:[#allocation1 + $0x8] sm:$0xff pattern:$0x75316420] }
  0x4b   : > { %394 = vmatpush.msra.mxu2 %v274_v46  ;;  %353 = vmatpush.msra.mxu0 %v275_v60 }
  0x4c   : > { %414 = vmatpush.msra.mxu3 %v306_v47  ;;  %373 = vmatpush.msra.mxu1 %v307_v61 }
  0x4d   : > { %395 = vmatpush.msra.mxu2 %v272_v50  ;;  %354 = vmatpush.msra.mxu0 %v273_v62 }
  0x4e   : > { %415 = vmatpush.msra.mxu3 %v304_v51  ;;  %374 = vmatpush.msra.mxu1 %v305_v63 }
  0x4f   : > { %396 = vmatpush.msra.mxu2 %v270_v54  ;;  %355 = vmatpush.msra.mxu0 %v271_v0 }
  0x50   : > { %416 = vmatpush.msra.mxu3 %v302_v55  ;;  %397 = vmatmul.f32.vlgmr.msra.gmra.mxu2 %v1520_v34 }
  0x51   : > { %417 = vmatmul.f32.vlgmr.msra.gmra.mxu3 %v1522_v35  ;;  %375 = vmatpush.msra.mxu1 %v303_v1 }
  0x52   : > { %356 = vmatpush.msra.mxu0 %v269_v2  ;;  %1108 = vmatpush.msk.msrb.mxu2 %vm586_vm0, %v487_v7 }
  0x53   : > { %376 = vmatpush.msra.mxu1 %v301_v3  ;;  %357 = vmatmul.f32.vlgmr.msra.gmra.mxu0 %v1520_v34 }
  0x54   : > { %377 = vmatmul.f32.vlgmr.msra.gmra.mxu1 %v1522_v35  ;;  %1034 = vmatpush.msk.msrb.mxu0 %vm586_vm0, %v487_v7 }
  0x55   : > { %1109 = vmatpush.msk.msrb.mxu3 %vm586_vm0, %v488_v8  ;;  %1067 = vmatpush.msk.msrb.mxu1 %vm586_vm0, %v488_v8 }
  0xd0   : > { %v358_v9 = vpop.f32.mrf.mxu0 }
  0xd1   : > { %v378_v10 = vpop.f32.mrf.mxu1 }
  0xd2   : > { %v379_v11 = vadd.f32 %v378_v10, %v358_v9 }
  0xd3   : > { %v398_v4 = vpop.f32.mrf.mxu2 }
  0xd4   : > { %v418_v5 = vpop.f32.mrf.mxu3 }
  0xd5   : > { %v419_v6 = vadd.f32 %v418_v5, %v398_v4 }
  0xd7   : > { %453 = vxpose.xlu0.b32.start.end [1/1] (short) %v419_v6, 128 }
 0x157   : > { %421 = vxpose.xlu0.b32.start.end [1/1] (short) %v379_v11, 128 }
 0x17b   : > { %v469_v12 = vpop.trf.xlu0 }
 0x17c   : > { %1051 = vmatmul.msk.f32.vlgmr.msrb.gmra.mxu2 %vm489_vm1, %v469_v12  ;;  %1084 = vmatmul.msk.f32.vlgmr.msrb.gmra.mxu3 %vm489_vm1, %v469_v12 }
 0x183   : > { %v470_v13 = vpop.trf.xlu0 }
 0x184   : > { %1052 = vmatmul.msk.f32.gmra.mxu2 %vm489_vm1, %v470_v13  ;;  %1085 = vmatmul.msk.f32.gmra.mxu3 %vm489_vm1, %v470_v13 }
 0x18b   : > { %v471_v14 = vpop.trf.xlu0 }
 0x18c   : > { %1053 = vmatmul.msk.f32.gmra.mxu2 %vm489_vm1, %v471_v14  ;;  %1086 = vmatmul.msk.f32.gmra.mxu3 %vm489_vm1, %v471_v14 }
 0x193   : > { %v472_v15 = vpop.trf.xlu0 }
 0x194   : > { %1054 = vmatmul.msk.f32.gmra.mxu2 %vm489_vm1, %v472_v15  ;;  %1087 = vmatmul.msk.f32.gmra.mxu3 %vm489_vm1, %v472_v15 }
 0x19b   : > { %v473_v16 = vpop.trf.xlu0 }
 0x19c   : > { %1055 = vmatmul.msk.f32.gmra.mxu2 %vm489_vm1, %v473_v16  ;;  %1088 = vmatmul.msk.f32.gmra.mxu3 %vm489_vm1, %v473_v16 }
 0x1a3   : > { %v474_v17 = vpop.trf.xlu0 }
 0x1a4   : > { %1056 = vmatmul.msk.f32.gmra.mxu2 %vm489_vm1, %v474_v17  ;;  %1089 = vmatmul.msk.f32.gmra.mxu3 %vm489_vm1, %v474_v17 }
 0x1ab   : > { %v475_v18 = vpop.trf.xlu0 }
 0x1ac   : > { %1057 = vmatmul.msk.f32.gmra.mxu2 %vm489_vm1, %v475_v18  ;;  %1090 = vmatmul.msk.f32.gmra.mxu3 %vm489_vm1, %v475_v18 }
 0x1b3   : > { %v476_v19 = vpop.trf.xlu0 }
 0x1b4   : > { %1058 = vmatmul.msk.f32.gmra.mxu2 %vm489_vm1, %v476_v19  ;;  %1091 = vmatmul.msk.f32.gmra.mxu3 %vm489_vm1, %v476_v19 }
 0x1bb   : > { %v477_v20 = vpop.trf.xlu0 }
 0x1bc   : > { %1059 = vmatmul.msk.f32.gmra.mxu2 %vm489_vm1, %v477_v20  ;;  %1092 = vmatmul.msk.f32.gmra.mxu3 %vm489_vm1, %v477_v20 }
 0x1c3   : > { %v478_v21 = vpop.trf.xlu0 }
 0x1c4   : > { %1060 = vmatmul.msk.f32.gmra.mxu2 %vm489_vm1, %v478_v21  ;;  %1093 = vmatmul.msk.f32.gmra.mxu3 %vm489_vm1, %v478_v21 }
 0x1cb   : > { %v479_v22 = vpop.trf.xlu0 }
 0x1cc   : > { %1061 = vmatmul.msk.f32.gmra.mxu2 %vm489_vm1, %v479_v22  ;;  %1094 = vmatmul.msk.f32.gmra.mxu3 %vm489_vm1, %v479_v22 }
 0x1d3   : > { %v480_v23 = vpop.trf.xlu0 }
 0x1d4   : > { %1062 = vmatmul.msk.f32.gmra.mxu2 %vm489_vm1, %v480_v23  ;;  %1095 = vmatmul.msk.f32.gmra.mxu3 %vm489_vm1, %v480_v23 }
 0x1db   : > { %v481_v24 = vpop.trf.xlu0 }
 0x1dc   : > { %1063 = vmatmul.msk.f32.gmra.mxu2 %vm489_vm1, %v481_v24  ;;  %1096 = vmatmul.msk.f32.gmra.mxu3 %vm489_vm1, %v481_v24 }
 0x1e3   : > { %v482_v25 = vpop.trf.xlu0 }
 0x1e4   : > { %1064 = vmatmul.msk.f32.gmra.mxu2 %vm489_vm1, %v482_v25  ;;  %1097 = vmatmul.msk.f32.gmra.mxu3 %vm489_vm1, %v482_v25 }
 0x1eb   : > { %v483_v26 = vpop.trf.xlu0 }
 0x1ec   : > { %1065 = vmatmul.msk.f32.gmra.mxu2 %vm489_vm1, %v483_v26  ;;  %1098 = vmatmul.msk.f32.gmra.mxu3 %vm489_vm1, %v483_v26 }
 0x1f3   : > { %v484_v27 = vpop.trf.xlu0 }
 0x1f4   : > { %1066 = vmatmul.msk.f32.gmra.mxu2 %vm489_vm1, %v484_v27  ;;  %1099 = vmatmul.msk.f32.gmra.mxu3 %vm489_vm1, %v484_v27 }
 0x1fb   : > { %v437_v28 = vpop.trf.xlu0 }
 0x1fc   : > { %1035 = vmatmul.msk.f32.vlgmr.msrb.gmra.mxu0 %vm489_vm1, %v437_v28  ;;  %1068 = vmatmul.msk.f32.vlgmr.msrb.gmra.mxu1 %vm489_vm1, %v437_v28 }
 0x1ff   : > { %v656_v29 = vpop.f32.mrf.mxu2  ;;  %v769_v30 = vpop.f32.mrf.mxu3 }
 0x200   : > { %849 = vst [vmem:[%s1563_s28 + $0x100] sm:$0xff] %v656_v29 }
 0x201   : > { %850 = vst [vmem:[%s1563_s28 + $0x108] sm:$0xff] %v769_v30 }
 0x203   : > { %v438_v31 = vpop.trf.xlu0 }
 0x204   : > { %1036 = vmatmul.msk.f32.gmra.mxu0 %vm489_vm1, %v438_v31  ;;  %1069 = vmatmul.msk.f32.gmra.mxu1 %vm489_vm1, %v438_v31 }
 0x207   : > { %v659_v32 = vpop.f32.mrf.mxu2  ;;  %v772_v33 = vpop.f32.mrf.mxu3 }
 0x208   : > { %851 = vst [vmem:[%s1563_s28 + $0x110] sm:$0xff] %v659_v32 }
 0x209   : > { %852 = vst [vmem:[%s1563_s28 + $0x118] sm:$0xff] %v772_v33 }
 0x20b   : > { %v439_v34 = vpop.trf.xlu0 }
 0x20c   : > { %1037 = vmatmul.msk.f32.gmra.mxu0 %vm489_vm1, %v439_v34  ;;  %1070 = vmatmul.msk.f32.gmra.mxu1 %vm489_vm1, %v439_v34 }
 0x20f   : > { %v662_v35 = vpop.f32.mrf.mxu2  ;;  %v775_v36 = vpop.f32.mrf.mxu3 }
 0x210   : > { %853 = vst [vmem:[%s1563_s28 + $0x120] sm:$0xff] %v662_v35 }
 0x211   : > { %854 = vst [vmem:[%s1563_s28 + $0x128] sm:$0xff] %v775_v36 }
 0x213   : > { %v440_v37 = vpop.trf.xlu0 }
 0x214   : > { %1038 = vmatmul.msk.f32.gmra.mxu0 %vm489_vm1, %v440_v37  ;;  %1071 = vmatmul.msk.f32.gmra.mxu1 %vm489_vm1, %v440_v37 }
 0x217   : > { %v665_v38 = vpop.f32.mrf.mxu2  ;;  %v778_v39 = vpop.f32.mrf.mxu3 }
 0x218   : > { %855 = vst [vmem:[%s1563_s28 + $0x130] sm:$0xff] %v665_v38 }
 0x219   : > { %856 = vst [vmem:[%s1563_s28 + $0x138] sm:$0xff] %v778_v39 }
 0x21b   : > { %v441_v40 = vpop.trf.xlu0 }
 0x21c   : > { %1039 = vmatmul.msk.f32.gmra.mxu0 %vm489_vm1, %v441_v40  ;;  %1072 = vmatmul.msk.f32.gmra.mxu1 %vm489_vm1, %v441_v40 }
 0x21f   : > { %v668_v41 = vpop.f32.mrf.mxu2  ;;  %v781_v42 = vpop.f32.mrf.mxu3 }
 0x220   : > { %857 = vst [vmem:[%s1563_s28 + $0x140] sm:$0xff] %v668_v41 }
 0x221   : > { %858 = vst [vmem:[%s1563_s28 + $0x148] sm:$0xff] %v781_v42 }
 0x223   : > { %v442_v43 = vpop.trf.xlu0 }
 0x224   : > { %1040 = vmatmul.msk.f32.gmra.mxu0 %vm489_vm1, %v442_v43  ;;  %1073 = vmatmul.msk.f32.gmra.mxu1 %vm489_vm1, %v442_v43 }
 0x227   : > { %v671_v44 = vpop.f32.mrf.mxu2  ;;  %v784_v45 = vpop.f32.mrf.mxu3 }
 0x228   : > { %859 = vst [vmem:[%s1563_s28 + $0x150] sm:$0xff] %v671_v44 }
 0x229   : > { %860 = vst [vmem:[%s1563_s28 + $0x158] sm:$0xff] %v784_v45 }
 0x22b   : > { %v443_v46 = vpop.trf.xlu0 }
 0x22c   : > { %1041 = vmatmul.msk.f32.gmra.mxu0 %vm489_vm1, %v443_v46  ;;  %1074 = vmatmul.msk.f32.gmra.mxu1 %vm489_vm1, %v443_v46 }
 0x22f   : > { %v674_v47 = vpop.f32.mrf.mxu2  ;;  %v787_v48 = vpop.f32.mrf.mxu3 }
 0x230   : > { %861 = vst [vmem:[%s1563_s28 + $0x160] sm:$0xff] %v674_v47 }
 0x231   : > { %862 = vst [vmem:[%s1563_s28 + $0x168] sm:$0xff] %v787_v48 }
 0x233   : > { %v444_v49 = vpop.trf.xlu0 }
 0x234   : > { %1042 = vmatmul.msk.f32.gmra.mxu0 %vm489_vm1, %v444_v49  ;;  %1075 = vmatmul.msk.f32.gmra.mxu1 %vm489_vm1, %v444_v49 }
 0x237   : > { %v677_v50 = vpop.f32.mrf.mxu2  ;;  %v790_v51 = vpop.f32.mrf.mxu3 }
 0x238   : > { %863 = vst [vmem:[%s1563_s28 + $0x170] sm:$0xff] %v677_v50 }
 0x239   : > { %864 = vst [vmem:[%s1563_s28 + $0x178] sm:$0xff] %v790_v51 }
 0x23b   : > { %v445_v52 = vpop.trf.xlu0 }
 0x23c   : > { %1043 = vmatmul.msk.f32.gmra.mxu0 %vm489_vm1, %v445_v52  ;;  %1076 = vmatmul.msk.f32.gmra.mxu1 %vm489_vm1, %v445_v52 }
 0x23f   : > { %v680_v53 = vpop.f32.mrf.mxu2  ;;  %v793_v54 = vpop.f32.mrf.mxu3 }
 0x240   : > { %865 = vst [vmem:[%s1563_s28 + $0x180] sm:$0xff] %v680_v53 }
 0x241   : > { %866 = vst [vmem:[%s1563_s28 + $0x188] sm:$0xff] %v793_v54 }
 0x243   : > { %v446_v55 = vpop.trf.xlu0 }
 0x244   : > { %1044 = vmatmul.msk.f32.gmra.mxu0 %vm489_vm1, %v446_v55  ;;  %1077 = vmatmul.msk.f32.gmra.mxu1 %vm489_vm1, %v446_v55 }
 0x247   : > { %v683_v56 = vpop.f32.mrf.mxu2  ;;  %v796_v57 = vpop.f32.mrf.mxu3 }
 0x248   : > { %867 = vst [vmem:[%s1563_s28 + $0x190] sm:$0xff] %v683_v56 }
 0x249   : > { %868 = vst [vmem:[%s1563_s28 + $0x198] sm:$0xff] %v796_v57 }
 0x24b   : > { %v447_v58 = vpop.trf.xlu0 }
 0x24c   : > { %1045 = vmatmul.msk.f32.gmra.mxu0 %vm489_vm1, %v447_v58  ;;  %1078 = vmatmul.msk.f32.gmra.mxu1 %vm489_vm1, %v447_v58 }
 0x24f   : > { %v686_v59 = vpop.f32.mrf.mxu2  ;;  %v799_v60 = vpop.f32.mrf.mxu3 }
 0x250   : > { %869 = vst [vmem:[%s1563_s28 + $0x1a0] sm:$0xff] %v686_v59 }
 0x251   : > { %870 = vst [vmem:[%s1563_s28 + $0x1a8] sm:$0xff] %v799_v60 }
 0x253   : > { %v448_v61 = vpop.trf.xlu0 }
 0x254   : > { %1046 = vmatmul.msk.f32.gmra.mxu0 %vm489_vm1, %v448_v61  ;;  %1079 = vmatmul.msk.f32.gmra.mxu1 %vm489_vm1, %v448_v61 }
 0x257   : > { %v689_v62 = vpop.f32.mrf.mxu2  ;;  %v802_v63 = vpop.f32.mrf.mxu3 }
 0x258   : > { %871 = vst [vmem:[%s1563_s28 + $0x1b0] sm:$0xff] %v689_v62 }
 0x259   : > { %872 = vst [vmem:[%s1563_s28 + $0x1b8] sm:$0xff] %v802_v63 }
 0x25b   : > { %v449_v0 = vpop.trf.xlu0 }
 0x25c   : > { %1047 = vmatmul.msk.f32.gmra.mxu0 %vm489_vm1, %v449_v0  ;;  %1080 = vmatmul.msk.f32.gmra.mxu1 %vm489_vm1, %v449_v0 }
 0x25f   : > { %v692_v1 = vpop.f32.mrf.mxu2  ;;  %v805_v2 = vpop.f32.mrf.mxu3 }
 0x260   : > { %873 = vst [vmem:[%s1563_s28 + $0x1c0] sm:$0xff] %v692_v1 }
 0x261   : > { %874 = vst [vmem:[%s1563_s28 + $0x1c8] sm:$0xff] %v805_v2 }
 0x263   : > { %v450_v3 = vpop.trf.xlu0 }
 0x264   : > { %1048 = vmatmul.msk.f32.gmra.mxu0 %vm489_vm1, %v450_v3  ;;  %1081 = vmatmul.msk.f32.gmra.mxu1 %vm489_vm1, %v450_v3 }
 0x267   : > { %v695_v4 = vpop.f32.mrf.mxu2  ;;  %v808_v5 = vpop.f32.mrf.mxu3 }
 0x268   : > { %875 = vst [vmem:[%s1563_s28 + $0x1d0] sm:$0xff] %v695_v4 }
 0x269   : > { %876 = vst [vmem:[%s1563_s28 + $0x1d8] sm:$0xff] %v808_v5 }
 0x26b   : > { %v451_v6 = vpop.trf.xlu0 }
 0x26c   : > { %1049 = vmatmul.msk.f32.gmra.mxu0 %vm489_vm1, %v451_v6  ;;  %1082 = vmatmul.msk.f32.gmra.mxu1 %vm489_vm1, %v451_v6 }
 0x26f   : > { %v698_v7 = vpop.f32.mrf.mxu2  ;;  %v811_v8 = vpop.f32.mrf.mxu3 }
 0x270   : > { %877 = vst [vmem:[%s1563_s28 + $0x1e0] sm:$0xff] %v698_v7 }
 0x271   : > { %878 = vst [vmem:[%s1563_s28 + $0x1e8] sm:$0xff] %v811_v8 }
 0x273   : > { %v452_v9 = vpop.trf.xlu0 }
 0x274   : > { %1050 = vmatmul.msk.f32.gmra.mxu0 %vm489_vm1, %v452_v9  ;;  %1083 = vmatmul.msk.f32.gmra.mxu1 %vm489_vm1, %v452_v9 }
 0x277   : > { %v701_v10 = vpop.f32.mrf.mxu2  ;;  %v814_v11 = vpop.f32.mrf.mxu3 }
 0x278   : > { %879 = vst [vmem:[%s1563_s28 + $0x1f0] sm:$0xff] %v701_v10 }
 0x279   : > { %880 = vst [vmem:[%s1563_s28 + $0x1f8] sm:$0xff] %v814_v11  ;;  %v608_v12 = vpop.f32.mrf.mxu0  ;;  %v721_v13 = vpop.f32.mrf.mxu1 }
 0x27a   : > { %817 = vst [vmem:[%s1563_s28] sm:$0xff] %v608_v12 }
 0x27b   : > { %818 = vst [vmem:[%s1563_s28 + $0x8] sm:$0xff] %v721_v13 }
 0x281   : > { %v611_v14 = vpop.f32.mrf.mxu0  ;;  %v724_v15 = vpop.f32.mrf.mxu1 }
 0x282   : > { %819 = vst [vmem:[%s1563_s28 + $0x10] sm:$0xff] %v611_v14 }
 0x283   : > { %820 = vst [vmem:[%s1563_s28 + $0x18] sm:$0xff] %v724_v15 }
 0x289   : > { %v614_v16 = vpop.f32.mrf.mxu0  ;;  %v727_v17 = vpop.f32.mrf.mxu1 }
 0x28a   : > { %821 = vst [vmem:[%s1563_s28 + $0x20] sm:$0xff] %v614_v16 }
 0x28b   : > { %822 = vst [vmem:[%s1563_s28 + $0x28] sm:$0xff] %v727_v17 }
 0x291   : > { %v617_v18 = vpop.f32.mrf.mxu0  ;;  %v730_v19 = vpop.f32.mrf.mxu1 }
 0x292   : > { %823 = vst [vmem:[%s1563_s28 + $0x30] sm:$0xff] %v617_v18 }
 0x293   : > { %824 = vst [vmem:[%s1563_s28 + $0x38] sm:$0xff] %v730_v19 }
 0x299   : > { %v620_v20 = vpop.f32.mrf.mxu0  ;;  %v733_v21 = vpop.f32.mrf.mxu1 }
 0x29a   : > { %825 = vst [vmem:[%s1563_s28 + $0x40] sm:$0xff] %v620_v20 }
 0x29b   : > { %826 = vst [vmem:[%s1563_s28 + $0x48] sm:$0xff] %v733_v21 }
 0x2a1   : > { %v623_v22 = vpop.f32.mrf.mxu0  ;;  %v736_v23 = vpop.f32.mrf.mxu1 }
 0x2a2   : > { %827 = vst [vmem:[%s1563_s28 + $0x50] sm:$0xff] %v623_v22 }
 0x2a3   : > { %828 = vst [vmem:[%s1563_s28 + $0x58] sm:$0xff] %v736_v23 }
 0x2a9   : > { %v626_v24 = vpop.f32.mrf.mxu0  ;;  %v739_v25 = vpop.f32.mrf.mxu1 }
 0x2aa   : > { %829 = vst [vmem:[%s1563_s28 + $0x60] sm:$0xff] %v626_v24 }
 0x2ab   : > { %830 = vst [vmem:[%s1563_s28 + $0x68] sm:$0xff] %v739_v25 }
 0x2b1   : > { %v629_v26 = vpop.f32.mrf.mxu0  ;;  %v742_v27 = vpop.f32.mrf.mxu1 }
 0x2b2   : > { %831 = vst [vmem:[%s1563_s28 + $0x70] sm:$0xff] %v629_v26 }
 0x2b3   : > { %832 = vst [vmem:[%s1563_s28 + $0x78] sm:$0xff] %v742_v27 }
 0x2b9   : > { %v632_v28 = vpop.f32.mrf.mxu0  ;;  %v745_v29 = vpop.f32.mrf.mxu1 }
 0x2ba   : > { %833 = vst [vmem:[%s1563_s28 + $0x80] sm:$0xff] %v632_v28 }
 0x2bb   : > { %834 = vst [vmem:[%s1563_s28 + $0x88] sm:$0xff] %v745_v29 }
 0x2c1   : > { %v635_v30 = vpop.f32.mrf.mxu0  ;;  %v748_v31 = vpop.f32.mrf.mxu1 }
 0x2c2   : > { %835 = vst [vmem:[%s1563_s28 + $0x90] sm:$0xff] %v635_v30 }
 0x2c3   : > { %836 = vst [vmem:[%s1563_s28 + $0x98] sm:$0xff] %v748_v31 }
 0x2c9   : > { %v638_v32 = vpop.f32.mrf.mxu0  ;;  %v751_v33 = vpop.f32.mrf.mxu1 }
 0x2ca   : > { %837 = vst [vmem:[%s1563_s28 + $0xa0] sm:$0xff] %v638_v32 }
 0x2cb   : > { %838 = vst [vmem:[%s1563_s28 + $0xa8] sm:$0xff] %v751_v33 }
 0x2d1   : > { %v641_v34 = vpop.f32.mrf.mxu0  ;;  %v754_v35 = vpop.f32.mrf.mxu1 }
 0x2d2   : > { %839 = vst [vmem:[%s1563_s28 + $0xb0] sm:$0xff] %v641_v34 }
 0x2d3   : > { %840 = vst [vmem:[%s1563_s28 + $0xb8] sm:$0xff] %v754_v35 }
 0x2d9   : > { %v644_v36 = vpop.f32.mrf.mxu0  ;;  %v757_v37 = vpop.f32.mrf.mxu1 }
 0x2da   : > { %841 = vst [vmem:[%s1563_s28 + $0xc0] sm:$0xff] %v644_v36 }
 0x2db   : > { %842 = vst [vmem:[%s1563_s28 + $0xc8] sm:$0xff] %v757_v37 }
 0x2e1   : > { %v647_v38 = vpop.f32.mrf.mxu0  ;;  %v760_v39 = vpop.f32.mrf.mxu1 }
 0x2e2   : > { %843 = vst [vmem:[%s1563_s28 + $0xd0] sm:$0xff] %v647_v38 }
 0x2e3   : > { %844 = vst [vmem:[%s1563_s28 + $0xd8] sm:$0xff] %v760_v39 }
 0x2e9   : > { %v650_v40 = vpop.f32.mrf.mxu0  ;;  %v763_v41 = vpop.f32.mrf.mxu1 }
 0x2ea   : > { %845 = vst [vmem:[%s1563_s28 + $0xe0] sm:$0xff] %v650_v40 }
 0x2eb   : > { %846 = vst [vmem:[%s1563_s28 + $0xe8] sm:$0xff] %v763_v41 }
 0x2f1   : > { %v653_v42 = vpop.f32.mrf.mxu0  ;;  %v766_v43 = vpop.f32.mrf.mxu1 }
 0x2f2   : > { %847 = vst [vmem:[%s1563_s28 + $0xf0] sm:$0xff] %v653_v42 }
 0x2f3   : > { %848 = vst [vmem:[%s1563_s28 + $0xf8] sm:$0xff] %v766_v43 }
 0x2f4   : > { %1310 = shalt.err (!%p1307_p13)
}
 0x2f5   : > { %s1378_s30 = smov 256   ;;  %s1379_s20 = smov 16  }
 0x2f6   : > { %1118 = dma.vmem_to_hbm [thread:$0]  (%p1471_p4), %s898_s23, 8192, %s900_s24, %s882_s25, %s1378_s30, %s1378_s30, %s1379_s20  }
 0x2f7 PF: > { %s914_s9 = sand.u32 1, %s1353_s12   ;;  %p1132_p0 = pnand %p1022_p6, %p1479_p7 }
 0x2f8   : > { %s915_s2 = scalar_lea.sflag [#allocation4], %s914_s9 }
 0x2f9   : > { %p1133_p2 = pneg %p1132_p0 }
 0x2fb   : > { %1348 = dma.done.wait (%p1133_p2), %s915_s2, 8192  }
 0x2fc   : > { %1350 = vsyncadd (%p1133_p2), %s915_s2, 4294959104  ;;  %s22_s17 = sadd.s32 1, %s1373_s17   ;;  %s1714_s16 = sld [smem:[#allocation15_spill]] }
 0x2fd   : > { %p19_p5 = scmp.ge.s32.totalorder %s22_s17, 4   ;;  %s1715_s15 = sld [smem:[#allocation13_spill]] }
 0x2fe   : > { %s1716_s6 = sld [smem:[#allocation14_spill]]  ;;  %s1717_s12 = smov %s1357_s13 }
 0x2ff   : > { %s1718_s13 = smov %s1361_s14 }
 0x300   :  { %21 = sbr.rel (!%p19_p5) target bundleno = 10 (0xa), region = 95 }
 0x302   : > { %s1719_s14 = smov %s1714_s16 }
 0x304   : > { %s1720_s16 = smov %s1716_s6 }
 0x305   :  { %921 = vsyncpa [#allocation3], 1 }
 0x306   :  { %923 = vsyncpa [#allocation3 + $0x1], 1 }
 0x307   :  { %924 = vsyncpa [#allocation6], 1 }
 0x308   :  { %926 = vsyncpa [#allocation6 + $0x1], 1 }
 0x309   :  { %927 = vsyncpa [#allocation4], 1 }
 0x30a   :  { %929 = vsyncpa [#allocation4 + $0x1], 1 }

</bundles_post_ra>
